<compile_context>
chip_gen: v5e
topology: v5e:2x2
jax: 0.10.0
libtpu: 0.0.40
codegen_flags: <defaults>
</compile_context>

<pallas_src>
import functools

import jax
import jax.numpy as jnp
from jax.experimental import pallas as pl
from jax.experimental.pallas import tpu as pltpu

SUBLANE_BF16 = 16   # bf16 packs 2 rows / sublane -> keep row counts %16 == 0
SMALL_BATCH_MAX_TILE = 1024   # below this, run the whole batch as one tile


def _round_up(x, m):
    return (x + m - 1) // m * m


def mlp_kernel(x_ref, w1_ref, b1_ref, w2_ref, b2_ref, w3_ref, b3_ref, o_ref):
    # x_ref: (TB, in_pad) bf16; weights bf16 (in, out); biases f32 (1, out).
    x = x_ref[...]

    # fc1 + ReLU  (bf16 x bf16 -> f32 accumulate on the MXU)
    h1 = jnp.dot(x, w1_ref[...], preferred_element_type=jnp.float32)
    h1 = jnp.maximum(h1 + b1_ref[...], 0.0).astype(jnp.bfloat16)

    # fc2 + ReLU
    h2 = jnp.dot(h1, w2_ref[...], preferred_element_type=jnp.float32)
    h2 = jnp.maximum(h2 + b2_ref[...], 0.0).astype(jnp.bfloat16)

    # fc3 (no activation) -> (TB, act_pad) f32 store (act_pad == 8 for CartPole)
    out = jnp.dot(h2, w3_ref[...], preferred_element_type=jnp.float32)
    o_ref[...] = (out + b3_ref[...]).astype(o_ref.dtype)


def init_mlp_params(key, n_states, n_actions, hidden_dim=128):
    """Logical (PyTorch-equivalent) f32 params.
    Weights stored as (in_features, out_features); biases as (1, out_features);
    init matches nn.Linear's default U(-1/sqrt(fan_in), 1/sqrt(fan_in))."""
    ks = jax.random.split(key, 6)

    def linear(kw, kb, fan_in, fan_out):
        bound = 1.0 / jnp.sqrt(jnp.float32(fan_in))
        w = jax.random.uniform(kw, (fan_in, fan_out), jnp.float32, -bound, bound)
        b = jax.random.uniform(kb, (1, fan_out), jnp.float32, -bound, bound)
        return w, b

    w1, b1 = linear(ks[0], ks[1], n_states, hidden_dim)
    w2, b2 = linear(ks[2], ks[3], hidden_dim, hidden_dim)
    w3, b3 = linear(ks[4], ks[5], hidden_dim, n_actions)
    return {"w1": w1, "b1": b1, "w2": w2, "b2": b2, "w3": w3, "b3": b3}


def prepare_kernel_params(params):
    """One-time (outside the RL hot loop) pad + cast to the kernel layout.
    Zero padding keeps the math identical to the unpadded forward pass.
    Minimal padding only: n_states -> multiple of 16 (bf16 sublane pair),
    n_actions -> multiple of 8 (f32 output last dim == full array dim)."""
    def pad2(a, rows, cols):
        return jnp.pad(a, ((0, rows - a.shape[0]), (0, cols - a.shape[1])))

    n_states, hidden = params["w1"].shape
    n_actions = params["w3"].shape[1]
    in_pad = max(SUBLANE_BF16, _round_up(n_states, SUBLANE_BF16))   # 4 -> 16
    act_pad = max(8, _round_up(n_actions, 8))                       # 2 -> 8

    kp = {
        "w1": pad2(params["w1"], in_pad, hidden).astype(jnp.bfloat16),
        "b1": params["b1"].astype(jnp.float32),
        "w2": params["w2"].astype(jnp.bfloat16),
        "b2": params["b2"].astype(jnp.float32),
        "w3": pad2(params["w3"], hidden, act_pad).astype(jnp.bfloat16),
        "b3": pad2(params["b3"], 1, act_pad).astype(jnp.float32),
    }
    meta = {"n_states": n_states, "n_actions": n_actions,
            "in_pad": in_pad, "act_pad": act_pad, "hidden": hidden}
    return kp, meta


def _choose_tile(B, tb):
    """Single tile for small (inference) batches; 512..1024-row tiles for
    large (replay/training) batches so pipelining/megacore actually pay."""
    B16 = _round_up(B, SUBLANE_BF16)
    if B16 <= SMALL_BATCH_MAX_TILE:
        return B16                                   # grid = (1,)
    tile = _round_up(max(512, min(tb, SMALL_BATCH_MAX_TILE)), SUBLANE_BF16)
    return tile


@functools.partial(jax.jit, static_argnames=("n_states", "n_actions", "tb"))
def _mlp_forward_impl(x, w1, b1, w2, b2, w3, b3, *, n_states, n_actions, tb):
    B = x.shape[0]
    in_pad = w1.shape[0]
    act_pad = w3.shape[1]

    tb_eff = _choose_tile(B, tb)
    B_pad = _round_up(B, tb_eff)
    grid = (B_pad // tb_eff,)

    # Minimal zero-padding, bf16 activations.
    x_p = jnp.pad(x, ((0, B_pad - B), (0, in_pad - n_states))).astype(jnp.bfloat16)

    const = lambda a: pl.BlockSpec(a.shape, lambda i: (0,) * a.ndim)  # DMA'd once

    out_p = pl.pallas_call(
        mlp_kernel,
        out_shape=jax.ShapeDtypeStruct((B_pad, act_pad), jnp.float32),
        grid=grid,
        in_specs=[
            pl.BlockSpec((tb_eff, in_pad), lambda i: (i, 0)),   # x: batch-tiled
            const(w1), const(b1), const(w2), const(b2), const(w3), const(b3),
        ],
        out_specs=pl.BlockSpec((tb_eff, act_pad), lambda i: (i, 0)),
        compiler_params=pltpu.CompilerParams(
            dimension_semantics=("parallel",)),  # only matters when grid > 1
    )(x_p, w1, b1, w2, b2, w3, b3)

    return out_p[:B, :n_actions]


def mlp_forward(x, kernel_params, meta, *, tb=512):
    """x: (B, n_states) float32 -> (B, n_actions) float32 Q-values."""
    kp = kernel_params
    return _mlp_forward_impl(
        x, kp["w1"], kp["b1"], kp["w2"], kp["b2"], kp["w3"], kp["b3"],
        n_states=meta["n_states"], n_actions=meta["n_actions"], tb=tb)


if __name__ == "__main__":
    # CartPole-like sizes: 4 state dims, 2 actions, hidden 128.
    # Batch of 10 (not a multiple of 16) exercises the pad/slice path and the
    # single-tile grid=(1,) fast path used during action selection.
    n_states, n_actions, hidden_dim, batch = 4, 2, 128, 10

    key = jax.random.PRNGKey(0)
    k_params, k_x = jax.random.split(key)
    params = init_mlp_params(k_params, n_states, n_actions, hidden_dim)
    kernel_params, meta = prepare_kernel_params(params)
    x = jax.random.normal(k_x, (batch, n_states), dtype=jnp.float32)

    out = mlp_forward(x, kernel_params, meta)
    out = jax.block_until_ready(out)
    assert out.shape == (batch, n_actions)

    # Also exercise the multi-tile path once (large replay-style batch).
    x_big = jax.random.normal(k_x, (2048, n_states), dtype=jnp.float32)
    out_big = jax.block_until_ready(mlp_forward(x_big, kernel_params, meta))
    assert out_big.shape == (2048, n_actions)

    # Pure-JAX reference with the same bf16-weight / f32-accumulate flow.
    xb = x.astype(jnp.bfloat16)
    w1b = params["w1"].astype(jnp.bfloat16)
    w2b = params["w2"].astype(jnp.bfloat16)
    w3b = params["w3"].astype(jnp.bfloat16)
    h1 = jnp.maximum(jnp.dot(xb, w1b, preferred_element_type=jnp.float32)
                     + params["b1"], 0.0).astype(jnp.bfloat16)
    h2 = jnp.maximum(jnp.dot(h1, w2b, preferred_element_type=jnp.float32)
                     + params["b2"], 0.0).astype(jnp.bfloat16)
    ref = jnp.dot(h2, w3b, preferred_element_type=jnp.float32) + params["b3"]
    assert jnp.allclose(out, ref, atol=2e-2, rtol=2e-2)

    # Loose sanity check against the full-f32 forward (bf16 rounding only diff).
    h1f = jnp.maximum(x @ params["w1"] + params["b1"], 0.0)
    h2f = jnp.maximum(h1f @ params["w2"] + params["b2"], 0.0)
    ref_f32 = h2f @ params["w3"] + params["b3"]
    assert jnp.allclose(out, ref_f32, atol=1e-1, rtol=1e-1)

    print("KERNEL_OK")
</pallas_src>

<mosaic_0001>
module attributes {stable_mosaic.version = 11 : i64} {
  func.func @mlp_kernel(%arg0: i32, %arg1: memref<16x16xbf16, #tpu.memory_space<vmem>>, %arg2: memref<16x128xbf16, #tpu.memory_space<vmem>>, %arg3: memref<1x128xf32, #tpu.memory_space<vmem>>, %arg4: memref<128x128xbf16, #tpu.memory_space<vmem>>, %arg5: memref<1x128xf32, #tpu.memory_space<vmem>>, %arg6: memref<128x8xbf16, #tpu.memory_space<vmem>>, %arg7: memref<1x8xf32, #tpu.memory_space<vmem>>, %arg8: memref<16x8xf32, #tpu.memory_space<vmem>>) attributes {dimension_semantics = [#tpu.dimension_semantics<parallel>], iteration_bounds = array<i64: 1>, scalar_prefetch = 0 : i64, scratch_operands = 0 : i64, tpu.core_type = #tpu.core_type<tc>, window_params = [{transform_indices = @transform_0, window_bounds = array<i64: 16, 16>}, {pipeline_mode = #tpu.pipeline_mode<synchronous>, transform_indices = @transform_1, window_bounds = array<i64: 16, 128>}, {pipeline_mode = #tpu.pipeline_mode<synchronous>, transform_indices = @transform_2, window_bounds = array<i64: 1, 128>}, {pipeline_mode = #tpu.pipeline_mode<synchronous>, transform_indices = @transform_3, window_bounds = array<i64: 128, 128>}, {pipeline_mode = #tpu.pipeline_mode<synchronous>, transform_indices = @transform_4, window_bounds = array<i64: 1, 128>}, {pipeline_mode = #tpu.pipeline_mode<synchronous>, transform_indices = @transform_5, window_bounds = array<i64: 128, 8>}, {pipeline_mode = #tpu.pipeline_mode<synchronous>, transform_indices = @transform_6, window_bounds = array<i64: 1, 8>}, {transform_indices = @transform_7, window_bounds = array<i64: 16, 8>}]} {
    %c0 = arith.constant 0 : index
    %c0_0 = arith.constant 0 : index
    %0 = vector.load %arg1[%c0, %c0_0] : memref<16x16xbf16, #tpu.memory_space<vmem>>, vector<16x16xbf16>
    %c0_1 = arith.constant 0 : index
    %c0_2 = arith.constant 0 : index
    %1 = vector.load %arg2[%c0_1, %c0_2] : memref<16x128xbf16, #tpu.memory_space<vmem>>, vector<16x128xbf16>
    %cst = arith.constant dense<0.000000e+00> : vector<16x128xf32>
    %2 = tpu.matmul %0, %1, %cst {dimension_numbers = #tpu.dot_dimension_numbers<[1], [0], [0], [1], [0, 0, 1, 1], [], []>} : vector<16x16xbf16>, vector<16x128xbf16>, vector<16x128xf32> -> vector<16x128xf32>
    %c0_3 = arith.constant 0 : index
    %c0_4 = arith.constant 0 : index
    %3 = vector.load %arg3[%c0_3, %c0_4] : memref<1x128xf32, #tpu.memory_space<vmem>>, vector<1x128xf32>
    %4 = vector.broadcast %3 : vector<1x128xf32> to vector<16x128xf32>
    %5 = arith.addf %2, %4 : vector<16x128xf32>
    %cst_5 = arith.constant 0.000000e+00 : f32
    %6 = vector.broadcast %cst_5 : f32 to vector<16x128xf32>
    %7 = arith.maximumf %5, %6 : vector<16x128xf32>
    %8 = arith.truncf %7 : vector<16x128xf32> to vector<16x128xbf16>
    %c0_6 = arith.constant 0 : index
    %c0_7 = arith.constant 0 : index
    %9 = vector.load %arg4[%c0_6, %c0_7] : memref<128x128xbf16, #tpu.memory_space<vmem>>, vector<128x128xbf16>
    %cst_8 = arith.constant dense<0.000000e+00> : vector<16x128xf32>
    %10 = tpu.matmul %8, %9, %cst_8 {dimension_numbers = #tpu.dot_dimension_numbers<[1], [0], [0], [1], [0, 0, 1, 1], [], []>} : vector<16x128xbf16>, vector<128x128xbf16>, vector<16x128xf32> -> vector<16x128xf32>
    %c0_9 = arith.constant 0 : index
    %c0_10 = arith.constant 0 : index
    %11 = vector.load %arg5[%c0_9, %c0_10] : memref<1x128xf32, #tpu.memory_space<vmem>>, vector<1x128xf32>
    %12 = vector.broadcast %11 : vector<1x128xf32> to vector<16x128xf32>
    %13 = arith.addf %10, %12 : vector<16x128xf32>
    %cst_11 = arith.constant 0.000000e+00 : f32
    %14 = vector.broadcast %cst_11 : f32 to vector<16x128xf32>
    %15 = arith.maximumf %13, %14 : vector<16x128xf32>
    %16 = arith.truncf %15 : vector<16x128xf32> to vector<16x128xbf16>
    %c0_12 = arith.constant 0 : index
    %c0_13 = arith.constant 0 : index
    %17 = vector.load %arg6[%c0_12, %c0_13] : memref<128x8xbf16, #tpu.memory_space<vmem>>, vector<128x8xbf16>
    %cst_14 = arith.constant dense<0.000000e+00> : vector<16x8xf32>
    %18 = tpu.matmul %16, %17, %cst_14 {dimension_numbers = #tpu.dot_dimension_numbers<[1], [0], [0], [1], [0, 0, 1, 1], [], []>} : vector<16x128xbf16>, vector<128x8xbf16>, vector<16x8xf32> -> vector<16x8xf32>
    %c0_15 = arith.constant 0 : index
    %c0_16 = arith.constant 0 : index
    %19 = vector.load %arg7[%c0_15, %c0_16] : memref<1x8xf32, #tpu.memory_space<vmem>>, vector<1x8xf32>
    %20 = vector.broadcast %19 : vector<1x8xf32> to vector<16x8xf32>
    %21 = arith.addf %18, %20 : vector<16x8xf32>
    %c0_17 = arith.constant 0 : index
    %c0_18 = arith.constant 0 : index
    %22 = vector.load %arg8[%c0_17, %c0_18] : memref<16x8xf32, #tpu.memory_space<vmem>>, vector<16x8xf32>
    tpu.vector_store %arg8[%c0_17, %c0_18], %21 {strides = array<i32>} : memref<16x8xf32, #tpu.memory_space<vmem>>, vector<16x8xf32>,
    return
  }
  func.func @transform_0(%arg0: i32) -> (i32, i32) {
    %c0_i32 = arith.constant 0 : i32
    %c0_i32_0 = arith.constant 0 : i32
    return %arg0, %c0_i32 : i32, i32
  }
  func.func @transform_1(%arg0: i32) -> (i32, i32) {
    %c0_i32 = arith.constant 0 : i32
    %c0_i32_0 = arith.constant 0 : i32
    %c0_i32_1 = arith.constant 0 : i32
    return %c0_i32, %c0_i32_0 : i32, i32
  }
  func.func @transform_2(%arg0: i32) -> (i32, i32) {
    %c0_i32 = arith.constant 0 : i32
    %c0_i32_0 = arith.constant 0 : i32
    %c0_i32_1 = arith.constant 0 : i32
    return %c0_i32, %c0_i32_0 : i32, i32
  }
  func.func @transform_3(%arg0: i32) -> (i32, i32) {
    %c0_i32 = arith.constant 0 : i32
    %c0_i32_0 = arith.constant 0 : i32
    %c0_i32_1 = arith.constant 0 : i32
    return %c0_i32, %c0_i32_0 : i32, i32
  }
  func.func @transform_4(%arg0: i32) -> (i32, i32) {
    %c0_i32 = arith.constant 0 : i32
    %c0_i32_0 = arith.constant 0 : i32
    %c0_i32_1 = arith.constant 0 : i32
    return %c0_i32, %c0_i32_0 : i32, i32
  }
  func.func @transform_5(%arg0: i32) -> (i32, i32) {
    %c0_i32 = arith.constant 0 : i32
    %c0_i32_0 = arith.constant 0 : i32
    %c0_i32_1 = arith.constant 0 : i32
    return %c0_i32, %c0_i32_0 : i32, i32
  }
  func.func @transform_6(%arg0: i32) -> (i32, i32) {
    %c0_i32 = arith.constant 0 : i32
    %c0_i32_0 = arith.constant 0 : i32
    %c0_i32_1 = arith.constant 0 : i32
    return %c0_i32, %c0_i32_0 : i32, i32
  }
  func.func @transform_7(%arg0: i32) -> (i32, i32) {
    %c0_i32 = arith.constant 0 : i32
    %c0_i32_0 = arith.constant 0 : i32
    return %arg0, %c0_i32 : i32, i32
  }
}

</mosaic_0001>

<bundles_post_ra>
// kernel: _mlp_forward_impl.1
= control target key start
LH: loop header
LB: loop body
LE: loop exit
PB: predicated region body
PF: predicated region fallthrough
CT: control target
= control target key end

     0   :  { %vm46_vm0 = vcmask 130048   ;;  %vm234_vm1 = vcmask 64512   ;;  %s444_s1 = inlined_call_operand.vmem [shape: bf16[16,128], index: 1, kind: input, shape index: {}]   ;;  %s445_s0 = inlined_call_operand.vmem [shape: bf16[16,16], index: 0, kind: input, shape index: {}]   ;;  %s446_s3 = inlined_call_operand.vmem [shape: bf16[128,128], index: 3, kind: input, shape index: {}]   ;;  %s447_s2 = inlined_call_operand.vmem [shape: f32[1,128], index: 2, kind: input, shape index: {}]   ;;  %s448_s4 = inlined_call_operand.vmem [shape: f32[1,128], index: 4, kind: input, shape index: {}]   ;;  %s449_s5 = inlined_call_operand.vmem [shape: bf16[128,8], index: 5, kind: input, shape index: {}]   ;;  %s450_s6 = inlined_call_operand.vmem [shape: f32[1,8], index: 6, kind: input, shape index: {}]   ;;  %s451_s7 = inlined_call_operand.vmem [shape: f32[16,8], index: 7, kind: output, shape index: {}]  }
   0x1   :  { %v315_v0 = vld [vmem:[%s444_s1] sm:$0xff]  ;;  %v323_v1 = vld [vmem:[%s446_s3 + $0x38] sm:$0xff]  ;;  %v322_v3 = vld [vmem:[%s446_s3 + $0x30] sm:$0xff] }
   0x2   :  { %v314_v2 = vld [vmem:[%s445_s0] sm:$0xff]  ;;  %57 = vmatpush.bf16.msra.mxu0 %v315_v0  ;;  %135 = vmatpush.bf16.msra.mxu1 %v323_v1  ;;  %v321_v4 = vld [vmem:[%s446_s3 + $0x28] sm:$0xff]  ;;  %v319_v6 = vld [vmem:[%s446_s3 + $0x18] sm:$0xff] }
   0x3   :  { %v320_v5 = vld [vmem:[%s446_s3 + $0x20] sm:$0xff]  ;;  %v318_v7 = vld [vmem:[%s446_s3 + $0x10] sm:$0xff]  ;;  %v317_v8 = vld [vmem:[%s446_s3 + $0x8] sm:$0xff] }
   0x4   :  { %v316_v9 = vld [vmem:[%s446_s3] sm:$0xff]  ;;  %v331_v10 = vld [vmem:[%s449_s5 + $0x38] sm:$0xff]  ;;  %v330_v11 = vld [vmem:[%s449_s5 + $0x30] sm:$0xff] }
   0x5   :  { %249 = vmatmul.msk.bf16.vlgmr.msra.gmra.mxu0 %vm46_vm0, %v314_v2  ;;  %220 = vmatpush.bf16.msra.mxu2 %v331_v10  ;;  %v329_v12 = vld [vmem:[%s449_s5 + $0x28] sm:$0xff]  ;;  %v328_v13 = vld [vmem:[%s449_s5 + $0x20] sm:$0xff]  ;;  %v327_v22 = vld [vmem:[%s449_s5 + $0x18] sm:$0xff] }
   0x6   :  { %136 = vmatpush.bf16.msra.mxu1 %v322_v3  ;;  %v332_v15 = vld [vmem:[%s447_s2] ss:$0 sm:$0xff]  ;;  %v326_v23 = vld [vmem:[%s449_s5 + $0x10] sm:$0xff]  ;;  %v325_v24 = vld [vmem:[%s449_s5 + $0x8] sm:$0xff] }
   0x7   :  { %v324_v25 = vld [vmem:[%s449_s5] sm:$0xff] }
   0x8   :  { %v333_v27 = vld [vmem:[%s448_s4] ss:$0 sm:$0xff] }
   0x9   :  { %221 = vmatpush.bf16.msra.mxu2 %v330_v11  ;;  %v334_v34 = vld [vmem:[%s450_s6] ss:$0 sm:$0xff] }
   0xa   :  { %137 = vmatpush.bf16.msra.mxu1 %v321_v4 }
   0xd   :  { %222 = vmatpush.bf16.msra.mxu2 %v329_v12 }
   0xe   :  { %138 = vmatpush.bf16.msra.mxu1 %v320_v5 }
  0x11   :  { %223 = vmatpush.bf16.msra.mxu2 %v328_v13 }
  0x12   :  { %139 = vmatpush.bf16.msra.mxu1 %v319_v6 }
  0x15   :  { %224 = vmatpush.bf16.msra.mxu2 %v327_v22 }
  0x16   :  { %140 = vmatpush.bf16.msra.mxu1 %v318_v7 }
  0x19   :  { %225 = vmatpush.bf16.msra.mxu2 %v326_v23 }
  0x1a   :  { %141 = vmatpush.bf16.msra.mxu1 %v317_v8 }
  0x1d   :  { %226 = vmatpush.bf16.msra.mxu2 %v325_v24 }
  0x1e   :  { %142 = vmatpush.bf16.msra.mxu1 %v316_v9 }
  0x21   :  { %227 = vmatpush.bf16.msra.mxu2 %v324_v25 }
  0x82   :  { %v59_v14 = vpop.f32.mrf.mxu0 }
  0x83   :  { %v60_v16 = vadd.f32 %v332_v15, %v59_v14 }
  0x85   :  { %v64_v19 = vmax.f32 %v60_v16, 0.0 }
  0x8a   :  { %v61_v17 = vpop.f32.mrf.mxu0 }
  0x8b   :  { %v62_v18 = vadd.f32 %v332_v15, %v61_v17 }
  0x8d   :  { %v65_v20 = vmax.f32 %v62_v18, 0.0 }
  0x8f   :  { %v66_v21 = vpack.c.bf16 %v65_v20, %v64_v19 }
  0x91   :  { %143 = vmatmul.bf16.vlgmr.msra.gmra.mxu1 %v66_v21 }
 0x10e   :  { %v144_v26 = vpop.f32.mrf.mxu1 }
 0x10f   :  { %v145_v28 = vadd.f32 %v333_v27, %v144_v26 }
 0x111   :  { %v149_v31 = vmax.f32 %v145_v28, 0.0 }
 0x116   :  { %v146_v29 = vpop.f32.mrf.mxu1 }
 0x117   :  { %v147_v30 = vadd.f32 %v333_v27, %v146_v29 }
 0x119   :  { %v150_v32 = vmax.f32 %v147_v30, 0.0 }
 0x11b   :  { %v151_v33 = vpack.c.bf16 %v150_v32, %v149_v31 }
 0x11d   :  { %228 = vmatmul.bf16.vlgmr.msra.gmra.mxu2 %v151_v33 }
 0x1a0   :  { %v229_v35 = vpop.f32.mrf.mxu2 }
 0x1a1   :  { %v230_v36 = vadd.f32 %v334_v34, %v229_v35 }
 0x1a3   :  { %235 = vst.msk [vmem:[%s451_s7] sm:$0xff] %vm234_vm1, %v230_v36 }
 0x1a8   :  { %v231_v37 = vpop.f32.mrf.mxu2 }
 0x1a9   :  { %v232_v38 = vadd.f32 %v334_v34, %v231_v37 }
 0x1ab   :  { %236 = vst.msk [vmem:[%s451_s7 + $0x8] sm:$0xff] %vm234_vm1, %v232_v38 }

</bundles_post_ra>
